<compile_context>
chip_gen: v7x
topology: tpu7x:2x2x1
jax: 0.10.0
libtpu: 0.0.40
codegen_flags: <defaults>
</compile_context>

<pallas_src>
import numpy as np
import jax
import jax.numpy as jnp
from jax.experimental import pallas as pl
from jax.experimental.pallas import tpu as pltpu

B, C, H, W = 2, 4, 16, 16
HW = H * W
FEAT_DIM = 32                      # synthetic "fc" feature width
POOL_DIM = (H // 2) * (W // 2)     # 2x2 avg pool -> 64 features
N_PAD = 128                        # lane-dense combined RHS width (zero-padded)


def identity_loss_kernel(out_ref, gt_ref, wc_ref, absr_ref):
    # Channel-SUM of the difference (the 1/C mean is folded into wc host-side).
    # The fc bias cancels in (fc_out - fc_gt) and both heads are linear, so
    # operating on the diff is exact for this stand-in network.
    d = jnp.sum(
        out_ref[...].astype(jnp.float32) - gt_ref[...].astype(jnp.float32),
        axis=1,
    )                                                           # (B, HW) f32

    # Single bf16 MXU pass with f32 accumulation against the combined,
    # scale-folded RHS (HW, 128). LHS cast done once, before the dot.
    r = jnp.dot(d.astype(jnp.bfloat16), wc_ref[...],
                preferred_element_type=jnp.float32)             # (B, 128) f32

    # Lane-dense VMEM output (unmasked vst); scalar sum finished in the wrapper.
    # Post-matmul math stays in f32 (v5e VPU has no bf16).
    absr_ref[...] = jnp.abs(r)


def identity_loss(out_nchw, gt_nchw, wc_bf16):
    b, c, h, w = out_nchw.shape
    # No wrapper-side dtype casts — pass inputs in their native dtype and cast
    # in-VMEM inside the kernel (free on the VPU, no extra HBM copy).
    o = out_nchw.reshape(b, c, h * w)
    g = gt_nchw.reshape(b, c, h * w)

    vmem = pl.BlockSpec(memory_space=pltpu.MemorySpace.VMEM)
    cost = pl.CostEstimate(
        flops=2 * b * (h * w) * N_PAD,
        transcendentals=0,
        bytes_accessed=(o.size * o.dtype.itemsize
                        + g.size * g.dtype.itemsize
                        + wc_bf16.size * wc_bf16.dtype.itemsize
                        + b * N_PAD * 4),
    )

    absr = pl.pallas_call(
        identity_loss_kernel,
        out_shape=jax.ShapeDtypeStruct((b, N_PAD), jnp.float32),
        in_specs=[vmem, vmem, vmem],
        out_specs=vmem,
        cost_estimate=cost,
    )(o, g, wc_bf16)

    # The L1-mean scales are strictly positive and folded into wc's columns,
    # and the zero-padded columns contribute nothing, so loss = sum(|r|).
    return jnp.sum(absr)


def build_grid(b, d):
    # Mirrors IdentityLoss.build_grid. Only needed for crop=True; NOT evaluated
    # in the crop=False forward path (it was pure wasted work).
    r = d // 2
    base_x = jnp.tile(jnp.linspace(-r, r, d)[None, :], (d, 1))[..., None]       # (d, d, 1)
    base = jnp.concatenate([base_x, jnp.transpose(base_x, (1, 0, 2))], axis=2)  # (d, d, 2)
    base = jnp.tile(base[None], (b, 1, 1, 1))                                   # (b, d, d, 2)
    bias = jnp.zeros_like(base)
    bias = bias.at[..., 0].set(64.0).at[..., 1].set(77.0)
    bias = bias - 64.0
    grid = (base + bias) / 64.0
    return jnp.transpose(grid, (0, 3, 1, 2))


def make_pool_matrix(h, w):
    # 2x2 average pooling as a (h*w, (h//2)*(w//2)) matrix with 0.25 entries.
    hp, wp = h // 2, w // 2
    p = np.zeros((h * w, hp * wp), dtype=np.float32)
    for ph in range(hp):
        for pw in range(wp):
            col = ph * wp + pw
            for dh in range(2):
                for dw in range(2):
                    row = (2 * ph + dh) * w + (2 * pw + dw)
                    p[row, col] = 0.25
    return np.asarray(p, dtype=np.float32)


def make_combined_rhs(w_fc, p_mat, batch, channels):
    # Host-side weight prep: concat fc + pool heads, fold the 1/C grayscale mean
    # and the L1-mean scales into the columns, zero-pad the lane dim to 128, and
    # store in bf16 (halves the dominant HBM DMA, native bf16 MXU path).
    fc_scale = 1.0 / (channels * batch * FEAT_DIM)
    pool_scale = 1.0 / (channels * batch * POOL_DIM)
    # Folding scales into the columns *before* abs() is only valid if they are
    # strictly positive.
    assert fc_scale > 0.0 and pool_scale > 0.0, "L1-mean scale folding requires positive scales"
    wc = np.zeros((HW, N_PAD), dtype=np.float32)
    wc[:, :FEAT_DIM] = np.asarray(w_fc, dtype=np.float32) * fc_scale
    wc[:, FEAT_DIM:FEAT_DIM + POOL_DIM] = p_mat * pool_scale
    return jnp.asarray(wc, dtype=jnp.bfloat16)


def reference_loss(out_nchw, gt_nchw, w_fc, b_fc, p_mat):
    # Unoptimized f32 reference mirroring the original module semantics
    # (grayscale -> fc(+bias)/pool features -> L1 mean per head, summed).
    go = jnp.mean(out_nchw, axis=1).reshape(out_nchw.shape[0], -1)
    gg = jnp.mean(gt_nchw, axis=1).reshape(gt_nchw.shape[0], -1)
    fc_o = go @ w_fc + b_fc
    fc_g = gg @ w_fc + b_fc
    pool_o = go @ p_mat
    pool_g = gg @ p_mat
    return jnp.mean(jnp.abs(fc_o - fc_g)) + jnp.mean(jnp.abs(pool_o - pool_g))


if __name__ == "__main__":
    key = jax.random.PRNGKey(0)
    k_out, k_gt, k_w = jax.random.split(key, 3)

    out_img = jax.random.normal(k_out, (B, C, H, W), dtype=jnp.float32)
    gt_img = jax.random.normal(k_gt, (B, C, H, W), dtype=jnp.float32)

    # Deterministic synthetic lightcnn parameters.
    w_fc = 0.02 * jax.random.normal(k_w, (HW, FEAT_DIM), dtype=jnp.float32)
    b_fc = jnp.zeros((1, FEAT_DIM), dtype=jnp.float32)   # cancels; reference only
    p_mat_np = make_pool_matrix(H, W)
    p_mat = jnp.asarray(p_mat_np)

    wc = make_combined_rhs(w_fc, p_mat_np, B, C)

    loss = identity_loss(out_img, gt_img, wc)
    jax.block_until_ready(loss)

    ref = reference_loss(out_img, gt_img, w_fc, b_fc, p_mat)
    # Tolerance reflects the bf16 weight/LHS quantization (f32 accumulation).
    assert jnp.allclose(loss, ref, rtol=2e-2, atol=2e-2), (loss, ref)

    print("KERNEL_OK")
</pallas_src>

<mosaic_0001>
module attributes {stable_mosaic.version = 11 : i64} {
  func.func @identity_loss_kernel(%arg0: memref<2x4x256xf32, #tpu.memory_space<vmem>>, %arg1: memref<2x4x256xf32, #tpu.memory_space<vmem>>, %arg2: memref<256x128xbf16, #tpu.memory_space<vmem>>, %arg3: memref<2x128xf32, #tpu.memory_space<vmem>>) attributes {dimension_semantics = [], scalar_prefetch = 0 : i64, scratch_operands = 0 : i64, tpu.core_type = #tpu.core_type<tc>} {
    %c0 = arith.constant 0 : index
    %c0_0 = arith.constant 0 : index
    %c0_1 = arith.constant 0 : index
    %0 = vector.load %arg0[%c0, %c0_0, %c0_1] : memref<2x4x256xf32, #tpu.memory_space<vmem>>, vector<2x4x256xf32>
    %c0_2 = arith.constant 0 : index
    %c0_3 = arith.constant 0 : index
    %c0_4 = arith.constant 0 : index
    %1 = vector.load %arg1[%c0_2, %c0_3, %c0_4] : memref<2x4x256xf32, #tpu.memory_space<vmem>>, vector<2x4x256xf32>
    %2 = arith.subf %0, %1 : vector<2x4x256xf32>
    %cst = arith.constant dense<0.000000e+00> : vector<2x256xf32>
    %3 = vector.multi_reduction <add>, %2, %cst [1] : vector<2x4x256xf32> to vector<2x256xf32>
    %4 = arith.truncf %3 : vector<2x256xf32> to vector<2x256xbf16>
    %c0_5 = arith.constant 0 : index
    %c0_6 = arith.constant 0 : index
    %5 = vector.load %arg2[%c0_5, %c0_6] : memref<256x128xbf16, #tpu.memory_space<vmem>>, vector<256x128xbf16>
    %cst_7 = arith.constant dense<0.000000e+00> : vector<2x128xf32>
    %6 = tpu.matmul %4, %5, %cst_7 {dimension_numbers = #tpu.dot_dimension_numbers<[1], [0], [0], [1], [0, 0, 1, 1], [], []>} : vector<2x256xbf16>, vector<256x128xbf16>, vector<2x128xf32> -> vector<2x128xf32>
    %7 = math.absf %6 : vector<2x128xf32>
    %c0_8 = arith.constant 0 : index
    %c0_9 = arith.constant 0 : index
    %8 = vector.load %arg3[%c0_8, %c0_9] : memref<2x128xf32, #tpu.memory_space<vmem>>, vector<2x128xf32>
    tpu.vector_store %arg3[%c0_8, %c0_9], %7 {strides = array<i32>} : memref<2x128xf32, #tpu.memory_space<vmem>>, vector<2x128xf32>,
    return
  }
}

</mosaic_0001>

<bundles_post_ra>
// kernel: tpu_custom_call.1
= control target key start
LH: loop header
LB: loop body
LE: loop exit
PB: predicated region body
PF: predicated region fallthrough
CT: control target
= control target key end

     0   :  { %8 = vsyncpa [#allocation3], 0  ;;  %s546_s0 = inlined_call_operand.hbm [shape: f32[2,4,256], index: 0, kind: input, shape index: {}]   ;;  %s547_s1 = inlined_call_operand.hbm [shape: f32[2,4,256], index: 1, kind: input, shape index: {}]   ;;  %s548_s2 = inlined_call_operand.hbm [shape: bf16[256,128], index: 2, kind: input, shape index: {}]   ;;  %s549_s3 = inlined_call_operand.hbm [shape: f32[2,128], index: 3, kind: output, shape index: {}]  }
   0x1   :  { %9 = vsyncpa [#allocation6], 0 }
   0x2   :  { %10 = vsyncpa [#allocation4], 0  ;;  %s459_s12 = smov [#allocation5]   ;;  %s460_s14 = smov [#allocation2]  }
   0x3   :  { %s28_s13 = sshll.u32 %s459_s12, 4  ;;  %s16_s15 = sshll.u32 %s460_s14, 4  ;;  %s29_s13 = int_to_ptr.vmem [resolvable:$true] %s28_s13  ;;  %s487_s15 = int_to_ptr.vmem [resolvable:$true] %s16_s15 }
   0x4   :  { %s365_s18 = scalar_lea.hbm %s547_s1, 256 }
   0x5   :  { %p366_p0 = scmp.ne.s32.totalorder %s547_s1, %s365_s18  ;;  %p369_p1 = scmp.lt.u32.totalorder %s365_s18, %s547_s1 }
   0x7   :  { %p371_p2 = pnand %p369_p1, %p366_p0 }
   0x9   :  { %374 = shalt.err (!%p371_p2)
}
   0xa   :  { %s375_s23 = scalar_lea.vmem %s29_s13, 256  ;;  %p380_p4 = scmp.lt.s32.totalorder %s29_s13, %s29_s13 }
   0xb   :  { %p376_p3 = scmp.ne.s32.totalorder %s29_s13, %s375_s23  ;;  %p381_p5 = scmp.lt.s32.totalorder %s375_s23, %s375_s23 }
   0xd   :  { %p382_p6 = por %p381_p5, %p380_p4 }
   0xf   :  { %p383_p7 = pnand %p382_p6, %p376_p3 }
  0x11   :  { %386 = shalt.err (!%p383_p7)
}
  0x12   :  { %s461_s24 = smov 128   ;;  %s462_s25 = smov 8  }
  0x13   :  { %34 = dma.hbm_to_vmem [thread:$0]  %s547_s1, 256, %s29_s13, [#allocation6], %s461_s24, %s461_s24, %s462_s25  }
  0x14   :  { %s387_s30 = scalar_lea.hbm %s546_s0, 256 }
  0x15   :  { %p388_p8 = scmp.ne.s32.totalorder %s546_s0, %s387_s30  ;;  %p391_p9 = scmp.lt.u32.totalorder %s387_s30, %s546_s0 }
  0x17   :  { %p393_p10 = pnand %p391_p9, %p388_p8 }
  0x19   :  { %396 = shalt.err (!%p393_p10)
}
  0x1a   :  { %s397_s8 = scalar_lea.vmem %s487_s15, 256  ;;  %p402_p12 = scmp.lt.s32.totalorder %s487_s15, %s487_s15 }
  0x1b   :  { %p398_p11 = scmp.ne.s32.totalorder %s487_s15, %s397_s8  ;;  %p403_p13 = scmp.lt.s32.totalorder %s397_s8, %s397_s8 }
  0x1d   :  { %p404_p0 = por %p403_p13, %p402_p12 }
  0x1f   :  { %p405_p1 = pnand %p404_p0, %p398_p11 }
  0x21   :  { %408 = shalt.err (!%p405_p1)
}
  0x22   :  { %22 = dma.hbm_to_vmem [thread:$0]  %s546_s0, 256, %s487_s15, [#allocation3], %s461_s24, %s461_s24, %s462_s25  }
  0x23   :  { %s463_s10 = smov [#allocation7]   ;;  %s409_s14 = scalar_lea.hbm %s548_s2, 2048 }
  0x24   :  { %s40_s11 = sshll.u32 %s463_s10, 4  ;;  %p410_p2 = scmp.ne.s32.totalorder %s548_s2, %s409_s14  ;;  %s41_s11 = int_to_ptr.vmem [resolvable:$true] %s40_s11 }
  0x25   :  { %p413_p3 = scmp.lt.u32.totalorder %s409_s14, %s548_s2 }
  0x27   :  { %p415_p4 = pnand %p413_p3, %p410_p2 }
  0x29   :  { %418 = shalt.err (!%p415_p4)
}
  0x2a   :  { %s419_s20 = scalar_lea.vmem %s41_s11, 2048  ;;  %p424_p6 = scmp.lt.s32.totalorder %s41_s11, %s41_s11 }
  0x2b   :  { %p420_p5 = scmp.ne.s32.totalorder %s41_s11, %s419_s20  ;;  %p425_p7 = scmp.lt.s32.totalorder %s419_s20, %s419_s20 }
  0x2d   :  { %p426_p8 = por %p425_p7, %p424_p6 }
  0x2f   :  { %p427_p9 = pnand %p426_p8, %p420_p5 }
  0x31   :  { %430 = shalt.err (!%p427_p9)
}
  0x32   :  { %s464_s0 = smov 64   ;;  %s465_s15 = smov 4  }
  0x33   :  { %46 = dma.hbm_to_vmem [thread:$0]  %s548_s2, 2048, %s41_s11, [#allocation6], %s464_s0, %s464_s0, %s465_s15  }
  0x34   :  { %453 = dma.done.wait [#allocation3], 256  }
  0x35   :  { %454 = vsyncadd [#allocation3], 4294967040 }
  0x36   :  { %455 = dma.done.wait [#allocation6], 2304  }
  0x37   :  { %456 = vsyncadd [#allocation6], 4294964992  ;;  %v349_v0 = vld [vmem:[#allocation7 + $0x40] sm:$0xff]   ;;  %v351_v2 = vld [vmem:[#allocation7 + $0x48] sm:$0xff]   ;;  %vm69_vm0 = vcmask 1043456   ;;  %vm142_vm1 = vcmask 1041409  }
  0x38   :  { %v350_v1 = vld [vmem:[#allocation7] sm:$0xff]   ;;  %319 = vmatprep.subr.bf16.mxu0 %v349_v0  ;;  %v352_v3 = vld [vmem:[#allocation7 + $0x8] sm:$0xff]   ;;  %v353_v4 = vld [vmem:[#allocation7 + $0x50] sm:$0xff]   ;;  %s466_s2 = smov [#allocation8]  }
  0x39   :  { %320 = vmatpush3.bf16.msra.mxu0 %v350_v1  ;;  %v354_v5 = vld [vmem:[#allocation7 + $0x10] sm:$0xff]   ;;  %v355_v6 = vld [vmem:[#allocation7 + $0x58] sm:$0xff]   ;;  %v357_v8 = vld [vmem:[#allocation7 + $0x60] sm:$0xff]   ;;  %s293_s23 = sshll.u32 %s466_s2, 4  ;;  %s294_s23 = int_to_ptr.vmem [resolvable:$true] %s293_s23 }
  0x3a   :  { %321 = vmatprep.subr.bf16.mxu0 %v351_v2  ;;  %v356_v7 = vld [vmem:[#allocation7 + $0x18] sm:$0xff]   ;;  %v358_v9 = vld [vmem:[#allocation7 + $0x20] sm:$0xff]   ;;  %v359_v10 = vld [vmem:[#allocation7 + $0x68] sm:$0xff]   ;;  %s431_s24 = scalar_lea.vmem %s294_s23, 32  ;;  %p436_p11 = scmp.lt.s32.totalorder %s294_s23, %s294_s23 }
  0x3b   :  { %v57_v11 = vld [vmem:[#allocation2] sm:$0xff]  ;;  %v58_v12 = vld [vmem:[#allocation2 + $0x8] sm:$0xff]  ;;  %v59_v13 = vld [vmem:[#allocation5] sm:$0xff]  ;;  %p432_p10 = scmp.ne.s32.totalorder %s294_s23, %s431_s24  ;;  %p437_p12 = scmp.lt.s32.totalorder %s431_s24, %s431_s24 }
  0x3c   :  { %v60_v14 = vld [vmem:[#allocation5 + $0x8] sm:$0xff]  ;;  %v61_v15 = vsub.f32 %v57_v11, %v59_v13  ;;  %v360_v17 = vld [vmem:[#allocation7 + $0x28] sm:$0xff]   ;;  %v361_v20 = vld [vmem:[#allocation7 + $0x70] sm:$0xff]  }
  0x3d   :  { %322 = vmatpush3.bf16.msra.mxu0 %v352_v3  ;;  %v62_v16 = vsub.f32 %v58_v12, %v60_v14  ;;  %v362_v29 = vld [vmem:[#allocation7 + $0x30] sm:$0xff]   ;;  %v363_v32 = vld [vmem:[#allocation7 + $0x78] sm:$0xff]   ;;  %p438_p13 = por %p437_p12, %p436_p11 }
  0x3e   :  { %323 = vmatprep.subr.bf16.mxu0 %v353_v4  ;;  %v65_v18 = vcombine.high %v61_v15, %v61_v15  ;;  %v70_v19 = vsel %vm69_vm0, %v61_v15, 0.0  ;;  %v364_v39 = vld [vmem:[#allocation7 + $0x38] sm:$0xff]  }
  0x3f   :  { %v66_v21 = vcombine.high %v62_v16, %v62_v16  ;;  %v71_v22 = vrot.slane %v70_v19, 4  ;;  %v84_v23 = vsel %vm69_vm0, %v62_v16, 0.0  ;;  %p439_p0 = pnand %p438_p13, %p432_p10 }
  0x40   :  { %v77_v24 = vsel %vm69_vm0, %v65_v18, 0.0  ;;  %v85_v25 = vrot.slane %v84_v23, 4 }
  0x41   :  { %324 = vmatpush3.bf16.msra.mxu0 %v354_v5  ;;  %v78_v26 = vrot.slane %v77_v24, 4  ;;  %v91_v27 = vsel %vm69_vm0, %v66_v21, 0.0  ;;  %v72_v28 = vadd.f32 %v71_v22, %v70_v19 }
  0x42   :  { %325 = vmatprep.subr.bf16.mxu0 %v355_v6  ;;  %v92_v30 = vrot.slane %v91_v27, 4  ;;  %v86_v31 = vadd.f32 %v85_v25, %v84_v23 }
  0x43   :  { %v79_v33 = vadd.f32 %v78_v26, %v77_v24  ;;  %v73_v34 = vrot.slane %v72_v28, 2 }
  0x44   :  { %v93_v35 = vadd.f32 %v92_v30, %v91_v27  ;;  %v87_v36 = vrot.slane %v86_v31, 2 }
  0x45   :  { %326 = vmatpush3.bf16.msra.mxu0 %v356_v7  ;;  %v80_v37 = vrot.slane %v79_v33, 2  ;;  %v74_v38 = vadd.f32 %v73_v34, %v72_v28 }
  0x46   :  { %327 = vmatprep.subr.bf16.mxu0 %v357_v8  ;;  %v94_v40 = vrot.slane %v93_v35, 2  ;;  %v88_v41 = vadd.f32 %v87_v36, %v86_v31 }
  0x47   :  { %v81_v42 = vadd.f32 %v80_v37, %v79_v33  ;;  %v75_v43 = vrot.slane %v74_v38, 1 }
  0x48   :  { %v95_v44 = vadd.f32 %v94_v40, %v93_v35  ;;  %v89_v45 = vrot.slane %v88_v41, 1 }
  0x49   :  { %328 = vmatpush3.bf16.msra.mxu0 %v358_v9  ;;  %v82_v46 = vrot.slane %v81_v42, 1  ;;  %v76_v47 = vadd.f32 %v75_v43, %v74_v38 }
  0x4a   :  { %329 = vmatprep.subr.bf16.mxu0 %v359_v10  ;;  %v96_v48 = vrot.slane %v95_v44, 1  ;;  %v90_v49 = vadd.f32 %v89_v45, %v88_v41 }
  0x4b   :  { %v83_v50 = vadd.f32 %v82_v46, %v81_v42  ;;  %v98_v51 = vpack.c.bf16 %v76_v47, %v76_v47 }
  0x4c   :  { %v97_v52 = vadd.f32 %v96_v48, %v95_v44  ;;  %v100_v53 = vpack.c.bf16 %v90_v49, %v90_v49 }
  0x4d   :  { %330 = vmatpush3.bf16.msra.mxu0 %v360_v17  ;;  %v99_v54 = vpack.c.bf16 %v83_v50, %v83_v50  ;;  %v138_v55 = vunpack.c.l.b16 %v98_v51 }
  0x4e   :  { %331 = vmatprep.subr.bf16.mxu0 %v361_v20  ;;  %v101_v56 = vpack.c.bf16 %v97_v52, %v97_v52  ;;  %v140_v57 = vunpack.c.l.b16 %v100_v53 }
  0x4f   :  { %v139_v58 = vunpack.c.l.b16 %v99_v54 }
  0x50   :  { %v141_v59 = vunpack.c.l.b16 %v101_v56  ;;  %v143_v60 = vsel %vm142_vm1, %v140_v57, %v138_v55 }
  0x51   :  { %332 = vmatpush3.bf16.msra.mxu0 %v362_v29  ;;  %v145_v62 = vpack.c.b16 %v143_v60, %v143_v60 }
  0x52   :  { %333 = vmatprep.subr.bf16.mxu0 %v363_v32  ;;  %v144_v61 = vsel %vm142_vm1, %v141_v59, %v139_v58 }
  0x53   :  { %v146_v63 = vpack.c.b16 %v144_v61, %v144_v61 }
  0x55   :  { %334 = vmatpush3.bf16.msra.mxu0 %v364_v39  ;;  %277 = vmatprep.mubr.bf16.mxu0 %v146_v63 }
  0x58   :  { %278 = vmatmul.mubr.bf16.vlgmr.msra.gmra.mrb[0].mxu0 %v145_v62 }
 0x12b   :  { %v335_v0 = vpop.f32.mrb[0].mxu0 }
 0x12c   :  { %v336_v1 = vpop.f32.mrb[1].mxu0 }
 0x12d   :  { %v337_v2 = vadd.f32 %v336_v1, %v335_v0  ;;  %v338_v3 = vpop.f32.mrb[2].mxu0 }
 0x12e   :  { %v339_v4 = vpop.f32.mrb[3].mxu0 }
 0x12f   :  { %v285_v5 = vand.u32 2147483647, %v337_v2 }
 0x131   :  { %286 = vst [vmem:[#allocation8] sm:$0x3] %v285_v5 }
 0x132   :  { %442 = shalt.err (!%p439_p0)
}
 0x133   :  { %s443_s27 = scalar_lea.hbm %s549_s3, 32 }
 0x134   :  { %p444_p1 = scmp.ne.s32.totalorder %s549_s3, %s443_s27  ;;  %p447_p2 = scmp.lt.u32.totalorder %s443_s27, %s549_s3 }
 0x136   :  { %p449_p3 = pnand %p447_p2, %p444_p1 }
 0x138   :  { %452 = shalt.err (!%p449_p3)
}
 0x139   :  { %296 = dma.vmem_to_hbm [thread:$0]  %s294_s23, 32, %s549_s3, [#allocation4]  }
 0x13a   :  { %457 = dma.done.wait [#allocation4], 32  }
 0x13b   :  { %458 = vsyncadd [#allocation4], 4294967264 }
 0x13c   :  { %300 = vsyncpa [#allocation3], 1 }
 0x13d   :  { %301 = vsyncpa [#allocation6], 1 }
 0x13e   :  { %302 = vsyncpa [#allocation4], 1 }

</bundles_post_ra>
